<compile_context>
chip_gen: v7x
topology: tpu7x:2x2x1
jax: 0.10.0
libtpu: 0.0.40
codegen_flags: <defaults>
</compile_context>

<pallas_src>
import jax
import jax.numpy as jnp
from jax.experimental import pallas as pl
from jax.experimental.pallas import tpu as pltpu


def _make_attention_kernel(psi_dim: int, total_dim: int):
    P = psi_dim

    def kernel(scal_ref, p_ref, o_ref):
        # Folded 1x1-conv scalars, resident in SMEM.
        c_fg = scal_ref[0]          # w_f . w_g
        gvh = scal_ref[1]           # gamma * (w_v . w_h)

        raw = p_ref[...]            # (TB, D), native dtype
        # Full-width unmasked store of the whole tile first (passthrough
        # columns done); psi columns are overwritten by one small masked store.
        o_ref[...] = raw

        x = raw.astype(jnp.float32)
        psi = x[:, :P]              # (TB, P)

        # Put the batch on the lane axis: (P, TB).  One small XLU transpose;
        # everything below is fully lane-dense VPU/EUP work.
        psi_t = psi.T               # (P, TB)
        cpsi = c_fg * psi_t         # (P, TB) == c_fg * psi[b, i]

        # Row max of s[j,i,b] = cpsi[i,b] * psi_t[j,b] over j, computed
        # analytically from sign(cpsi): avoids any (P, P, TB) intermediate.
        psi_max = jnp.max(psi_t, axis=0, keepdims=True)    # (1, TB)
        psi_min = jnp.min(psi_t, axis=0, keepdims=True)    # (1, TB)
        m = jnp.where(cpsi >= 0.0, cpsi * psi_max, cpsi * psi_min)

        # Softmax denominator and numerator accumulated over j (unrolled,
        # P is small and static); live set stays a handful of (P, TB) slabs.
        den = jnp.zeros_like(cpsi)
        num = jnp.zeros_like(cpsi)
        for j in range(P):
            pj = psi_t[j:j + 1, :]                         # (1, TB)
            e = jnp.exp(cpsi * pj - m)                     # EUP, exponent <= 0
            den = den + e
            num = num + e * pj

        # EUP vrcp seed + one Newton step: full f32 accuracy, negligible cost.
        inv = pl.reciprocal(den, approx=True)
        inv = inv * (2.0 - den * inv)
        ctx = num * inv                                    # (A @ psi)^T, (P, TB)

        psi_out = gvh * ctx + psi_t                        # gamma*selfattn + psi
        o_ref[:, :P] = psi_out.T.astype(o_ref.dtype)       # single small masked store

    return kernel


def attention_forward(params, w_f, w_g, w_h, w_v, gamma, psi_dim, *, block_b=512):
    """Forward pass of Attention. params: (B, D) with D >= psi_dim -> (B, D)."""
    B, D = params.shape
    assert D >= psi_dim

    block_b = min(block_b, B)
    # Demo wrapper keeps tiling simple: batch must be a multiple of the tile.
    # (Ragged batches would need padding or a pl.cdiv grid with row masking.)
    assert B % block_b == 0, "batch must be divisible by the batch tile"
    grid = (B // block_b,)

    f32 = jnp.float32
    # Fold the 1x1 convs: f^T g -> (w_f.w_g); v(h^T .) and gamma -> gamma*(w_v.w_h).
    c_fg = jnp.dot(w_f.reshape(-1).astype(f32), w_g.reshape(-1).astype(f32))
    gvh = jnp.asarray(gamma, f32).reshape(()) * jnp.dot(
        w_v.reshape(-1).astype(f32), w_h.reshape(-1).astype(f32))
    scal = jnp.stack([c_fg, gvh])                           # (2,) f32 -> SMEM

    itemsize = jnp.dtype(params.dtype).itemsize
    tile_bytes = block_b * D * itemsize
    # 2x double-buffered input + output tiles plus headroom for compute temps.
    # (Keeps big tiles pipelined on v5e's 16 MiB scoped default; stays well
    #  under v7x's 64 MiB physical VMEM for reasonable block_b.)
    vmem_limit = int(min(max(4 * tile_bytes + (4 << 20), 32 << 20), 100 << 20))

    P = psi_dim
    cost = pl.CostEstimate(
        flops=int(B * (6 * P * P + 12 * P)),
        transcendentals=int(B * (P * P + P)),
        bytes_accessed=int(2 * B * D * itemsize + 8),
    )

    return pl.pallas_call(
        _make_attention_kernel(psi_dim, D),
        out_shape=jax.ShapeDtypeStruct((B, D), params.dtype),
        grid=grid,
        in_specs=[
            pl.BlockSpec(memory_space=pltpu.MemorySpace.SMEM),   # folded scalars
            pl.BlockSpec((block_b, D), lambda i: (i, 0)),        # streamed batch tiles
        ],
        out_specs=pl.BlockSpec((block_b, D), lambda i: (i, 0)),
        compiler_params=pltpu.CompilerParams(
            dimension_semantics=("parallel",),    # megacore / v7x 2-TC batch split
            vmem_limit_bytes=vmem_limit,
        ),
        cost_estimate=cost,
    )(scal, params)


def attention_reference(params, w_f, w_g, w_h, w_v, gamma, psi_dim):
    """Plain-JAX transcription of the PyTorch forward (unfolded), for checking."""
    psi = params[:, :psi_dim].astype(jnp.float32)                 # (B, P)
    x = psi[:, None, :]                                           # (B, 1, P)
    f = w_f[None, :, None] * x                                    # (B, H, P)
    g = w_g[None, :, None] * x
    h = w_h[None, :, None] * x
    scores = jnp.einsum('bph,bhq->bpq', jnp.swapaxes(f, 1, 2), g)     # bmm(f^T, g)
    amap = jax.nn.softmax(scores, axis=2)
    ctx = jnp.einsum('bpq,bqh->bph', amap, jnp.swapaxes(h, 1, 2))     # bmm(A, h^T)
    sa = jnp.einsum('h,bhp->bp', w_v, jnp.swapaxes(ctx, 1, 2))        # v_net(.^T)[:,0,:]
    psi_att = gamma * sa + psi
    return jnp.concatenate([psi_att, params[:, psi_dim:].astype(jnp.float32)], axis=1)


if __name__ == "__main__":
    # Shapes consistent with the module.  D = 128 keeps rows lane-dense; the
    # batch of 1024 with a 256-row tile gives a 4-step grid so the DMA
    # pipeline / parallel axis is actually exercised (>= 2 TC shards on v7x).
    psi_dim, hidden_dim = 8, 32
    extra_dim = 120                    # passthrough features -> D = 128
    batch = 1024

    key = jax.random.PRNGKey(0)
    kp, kf, kg, kh, kv = jax.random.split(key, 5)
    params = jax.random.normal(kp, (batch, psi_dim + extra_dim), dtype=jnp.float32)
    w_f = 0.3 * jax.random.normal(kf, (hidden_dim,), dtype=jnp.float32)
    w_g = 0.3 * jax.random.normal(kg, (hidden_dim,), dtype=jnp.float32)
    w_h = 0.3 * jax.random.normal(kh, (hidden_dim,), dtype=jnp.float32)
    w_v = jax.random.normal(kv, (hidden_dim,), dtype=jnp.float32) / hidden_dim ** 0.5
    # PyTorch initializes gamma to 0.0 (output == params); use a nonzero value
    # so the attention path is actually exercised by the check below.
    gamma = jnp.float32(0.5)

    out = attention_forward(params, w_f, w_g, w_h, w_v, gamma, psi_dim, block_b=256)
    jax.block_until_ready(out)

    ref = attention_reference(params, w_f, w_g, w_h, w_v, gamma, psi_dim)
    assert out.shape == ref.shape == (batch, psi_dim + extra_dim)
    max_err = float(jnp.max(jnp.abs(out.astype(jnp.float32) - ref)))
    assert jnp.allclose(out.astype(jnp.float32), ref, atol=1e-4, rtol=1e-4), \
        f"mismatch vs ref: {max_err}"

    print("KERNEL_OK")
</pallas_src>

<mosaic_0001>
module attributes {stable_mosaic.version = 11 : i64} {
  func.func @kernel(%arg0: i32, %arg1: memref<2xf32, #tpu.memory_space<smem>>, %arg2: memref<256x128xf32, #tpu.memory_space<vmem>>, %arg3: memref<256x128xf32, #tpu.memory_space<vmem>>) attributes {dimension_semantics = [#tpu.dimension_semantics<parallel>], iteration_bounds = array<i64: 4>, scalar_prefetch = 0 : i64, scratch_operands = 0 : i64, tpu.core_type = #tpu.core_type<tc>, window_params = [{transform_indices = @transform_0, window_bounds = array<i64: 2>}, {transform_indices = @transform_1, window_bounds = array<i64: 256, 128>}, {transform_indices = @transform_2, window_bounds = array<i64: 256, 128>}]} {
    %c0 = arith.constant 0 : index
    %0 = memref.load %arg1[%c0] : memref<2xf32, #tpu.memory_space<smem>>
    %c1 = arith.constant 1 : index
    %1 = memref.load %arg1[%c1] : memref<2xf32, #tpu.memory_space<smem>>
    %c0_0 = arith.constant 0 : index
    %c0_1 = arith.constant 0 : index
    %2 = vector.load %arg2[%c0_0, %c0_1] : memref<256x128xf32, #tpu.memory_space<vmem>>, vector<256x128xf32>
    %c0_2 = arith.constant 0 : index
    %c0_3 = arith.constant 0 : index
    %3 = vector.load %arg3[%c0_2, %c0_3] : memref<256x128xf32, #tpu.memory_space<vmem>>, vector<256x128xf32>
    tpu.vector_store %arg3[%c0_2, %c0_3], %2 {strides = array<i32>} : memref<256x128xf32, #tpu.memory_space<vmem>>, vector<256x128xf32>,
    %4 = vector.extract_strided_slice %2 {offsets = [0, 0], sizes = [256, 8], strides = [1, 1]} : vector<256x128xf32> to vector<256x8xf32>
    %5 = tpu.transpose %4, [1, 0] : vector<256x8xf32> -> vector<8x256xf32>
    %6 = vector.broadcast %0 : f32 to vector<8x256xf32>
    %7 = arith.mulf %6, %5 : vector<8x256xf32>
    %cst = arith.constant dense<0xFF800000> : vector<256xf32>
    %8 = vector.multi_reduction <maximumf>, %5, %cst [0] : vector<8x256xf32> to vector<256xf32>
    %9 = vector.shape_cast %8 : vector<256xf32> to vector<1x256xf32>
    %cst_4 = arith.constant dense<0x7F800000> : vector<256xf32>
    %10 = vector.multi_reduction <minimumf>, %5, %cst_4 [0] : vector<8x256xf32> to vector<256xf32>
    %11 = vector.shape_cast %10 : vector<256xf32> to vector<1x256xf32>
    %cst_5 = arith.constant 0.000000e+00 : f32
    %12 = vector.broadcast %cst_5 : f32 to vector<8x256xf32>
    %13 = arith.cmpf oge, %7, %12 : vector<8x256xf32>
    %14 = vector.broadcast %9 : vector<1x256xf32> to vector<8x256xf32>
    %15 = arith.mulf %7, %14 : vector<8x256xf32>
    %16 = vector.broadcast %11 : vector<1x256xf32> to vector<8x256xf32>
    %17 = arith.mulf %7, %16 : vector<8x256xf32>
    %18 = arith.select %13, %15, %17 : vector<8x256xi1>, vector<8x256xf32>
    %cst_6 = arith.constant 0.000000e+00 : f32
    %19 = vector.broadcast %cst_6 : f32 to vector<8x256xf32>
    %cst_7 = arith.constant 0.000000e+00 : f32
    %20 = vector.broadcast %cst_7 : f32 to vector<8x256xf32>
    %21 = vector.extract_strided_slice %5 {offsets = [0, 0], sizes = [1, 256], strides = [1, 1]} : vector<8x256xf32> to vector<1x256xf32>
    %22 = vector.broadcast %21 : vector<1x256xf32> to vector<8x256xf32>
    %23 = arith.mulf %7, %22 : vector<8x256xf32>
    %24 = arith.subf %23, %18 : vector<8x256xf32>
    %25 = math.exp %24 : vector<8x256xf32>
    %26 = arith.addf %19, %25 : vector<8x256xf32>
    %27 = vector.broadcast %21 : vector<1x256xf32> to vector<8x256xf32>
    %28 = arith.mulf %25, %27 : vector<8x256xf32>
    %29 = arith.addf %20, %28 : vector<8x256xf32>
    %30 = vector.extract_strided_slice %5 {offsets = [1, 0], sizes = [1, 256], strides = [1, 1]} : vector<8x256xf32> to vector<1x256xf32>
    %31 = vector.broadcast %30 : vector<1x256xf32> to vector<8x256xf32>
    %32 = arith.mulf %7, %31 : vector<8x256xf32>
    %33 = arith.subf %32, %18 : vector<8x256xf32>
    %34 = math.exp %33 : vector<8x256xf32>
    %35 = arith.addf %26, %34 : vector<8x256xf32>
    %36 = vector.broadcast %30 : vector<1x256xf32> to vector<8x256xf32>
    %37 = arith.mulf %34, %36 : vector<8x256xf32>
    %38 = arith.addf %29, %37 : vector<8x256xf32>
    %39 = vector.extract_strided_slice %5 {offsets = [2, 0], sizes = [1, 256], strides = [1, 1]} : vector<8x256xf32> to vector<1x256xf32>
    %40 = vector.broadcast %39 : vector<1x256xf32> to vector<8x256xf32>
    %41 = arith.mulf %7, %40 : vector<8x256xf32>
    %42 = arith.subf %41, %18 : vector<8x256xf32>
    %43 = math.exp %42 : vector<8x256xf32>
    %44 = arith.addf %35, %43 : vector<8x256xf32>
    %45 = vector.broadcast %39 : vector<1x256xf32> to vector<8x256xf32>
    %46 = arith.mulf %43, %45 : vector<8x256xf32>
    %47 = arith.addf %38, %46 : vector<8x256xf32>
    %48 = vector.extract_strided_slice %5 {offsets = [3, 0], sizes = [1, 256], strides = [1, 1]} : vector<8x256xf32> to vector<1x256xf32>
    %49 = vector.broadcast %48 : vector<1x256xf32> to vector<8x256xf32>
    %50 = arith.mulf %7, %49 : vector<8x256xf32>
    %51 = arith.subf %50, %18 : vector<8x256xf32>
    %52 = math.exp %51 : vector<8x256xf32>
    %53 = arith.addf %44, %52 : vector<8x256xf32>
    %54 = vector.broadcast %48 : vector<1x256xf32> to vector<8x256xf32>
    %55 = arith.mulf %52, %54 : vector<8x256xf32>
    %56 = arith.addf %47, %55 : vector<8x256xf32>
    %57 = vector.extract_strided_slice %5 {offsets = [4, 0], sizes = [1, 256], strides = [1, 1]} : vector<8x256xf32> to vector<1x256xf32>
    %58 = vector.broadcast %57 : vector<1x256xf32> to vector<8x256xf32>
    %59 = arith.mulf %7, %58 : vector<8x256xf32>
    %60 = arith.subf %59, %18 : vector<8x256xf32>
    %61 = math.exp %60 : vector<8x256xf32>
    %62 = arith.addf %53, %61 : vector<8x256xf32>
    %63 = vector.broadcast %57 : vector<1x256xf32> to vector<8x256xf32>
    %64 = arith.mulf %61, %63 : vector<8x256xf32>
    %65 = arith.addf %56, %64 : vector<8x256xf32>
    %66 = vector.extract_strided_slice %5 {offsets = [5, 0], sizes = [1, 256], strides = [1, 1]} : vector<8x256xf32> to vector<1x256xf32>
    %67 = vector.broadcast %66 : vector<1x256xf32> to vector<8x256xf32>
    %68 = arith.mulf %7, %67 : vector<8x256xf32>
    %69 = arith.subf %68, %18 : vector<8x256xf32>
    %70 = math.exp %69 : vector<8x256xf32>
    %71 = arith.addf %62, %70 : vector<8x256xf32>
    %72 = vector.broadcast %66 : vector<1x256xf32> to vector<8x256xf32>
    %73 = arith.mulf %70, %72 : vector<8x256xf32>
    %74 = arith.addf %65, %73 : vector<8x256xf32>
    %75 = vector.extract_strided_slice %5 {offsets = [6, 0], sizes = [1, 256], strides = [1, 1]} : vector<8x256xf32> to vector<1x256xf32>
    %76 = vector.broadcast %75 : vector<1x256xf32> to vector<8x256xf32>
    %77 = arith.mulf %7, %76 : vector<8x256xf32>
    %78 = arith.subf %77, %18 : vector<8x256xf32>
    %79 = math.exp %78 : vector<8x256xf32>
    %80 = arith.addf %71, %79 : vector<8x256xf32>
    %81 = vector.broadcast %75 : vector<1x256xf32> to vector<8x256xf32>
    %82 = arith.mulf %79, %81 : vector<8x256xf32>
    %83 = arith.addf %74, %82 : vector<8x256xf32>
    %84 = vector.extract_strided_slice %5 {offsets = [7, 0], sizes = [1, 256], strides = [1, 1]} : vector<8x256xf32> to vector<1x256xf32>
    %85 = vector.broadcast %84 : vector<1x256xf32> to vector<8x256xf32>
    %86 = arith.mulf %7, %85 : vector<8x256xf32>
    %87 = arith.subf %86, %18 : vector<8x256xf32>
    %88 = math.exp %87 : vector<8x256xf32>
    %89 = arith.addf %80, %88 : vector<8x256xf32>
    %90 = vector.broadcast %84 : vector<1x256xf32> to vector<8x256xf32>
    %91 = arith.mulf %88, %90 : vector<8x256xf32>
    %92 = arith.addf %83, %91 : vector<8x256xf32>
    %93 = tpu.reciprocal %89 {approx = true} : vector<8x256xf32> -> vector<8x256xf32>
    %94 = arith.mulf %89, %93 : vector<8x256xf32>
    %cst_8 = arith.constant 2.000000e+00 : f32
    %95 = vector.broadcast %cst_8 : f32 to vector<8x256xf32>
    %96 = arith.subf %95, %94 : vector<8x256xf32>
    %97 = arith.mulf %93, %96 : vector<8x256xf32>
    %98 = arith.mulf %92, %97 : vector<8x256xf32>
    %99 = vector.broadcast %1 : f32 to vector<8x256xf32>
    %100 = arith.mulf %99, %98 : vector<8x256xf32>
    %101 = arith.addf %100, %5 : vector<8x256xf32>
    %102 = tpu.transpose %101, [1, 0] : vector<8x256xf32> -> vector<256x8xf32>
    %c0_9 = arith.constant 0 : index
    %c0_10 = arith.constant 0 : index
    %103 = vector.load %arg3[%c0_9, %c0_10] : memref<256x128xf32, #tpu.memory_space<vmem>>, vector<256x8xf32>
    tpu.vector_store %arg3[%c0_9, %c0_10], %102 {strides = array<i32>} : memref<256x128xf32, #tpu.memory_space<vmem>>, vector<256x8xf32>,
    return
  }
  func.func @transform_0(%arg0: i32) -> i32 {
    %c0_i32 = arith.constant 0 : i32
    %c0_i32_0 = arith.constant 0 : i32
    return %c0_i32 : i32
  }
  func.func @transform_1(%arg0: i32) -> (i32, i32) {
    %c0_i32 = arith.constant 0 : i32
    %c0_i32_0 = arith.constant 0 : i32
    return %arg0, %c0_i32 : i32, i32
  }
  func.func @transform_2(%arg0: i32) -> (i32, i32) {
    %c0_i32 = arith.constant 0 : i32
    %c0_i32_0 = arith.constant 0 : i32
    return %arg0, %c0_i32 : i32, i32
  }
}

</mosaic_0001>

<bundles_post_ra>
// kernel: tpu_custom_call.1
= control target key start
LH: loop header
LB: loop body
LE: loop exit
PB: predicated region body
PF: predicated region fallthrough
CT: control target
= control target key end

     0   :  { %7 = vsyncpa [#allocation5], 0  ;;  %s1435_s0 = inlined_call_operand.hbm [shape: f32[2], index: 0, kind: input, shape index: {}]   ;;  %s1436_s1 = inlined_call_operand.hbm [shape: f32[1024,128], index: 1, kind: input, shape index: {}]   ;;  %s1437_s2 = inlined_call_operand.hbm [shape: f32[1024,128], index: 2, kind: output, shape index: {}]  }
   0x1   :  { %8 = vsyncpa [#allocation3], 0 }
   0x2   :  { %10 = vsyncpa [#allocation3 + $0x1], 0 }
   0x3   :  { %11 = vsyncpa [#allocation4], 0 }
   0x4   :  { %13 = vsyncpa [#allocation4 + $0x1], 0  ;;  %s982_s9 = smov 0   ;;  %s984_s10 = smov 0  }
   0x5   :  { %s986_s11 = smov 0   ;;  %s988_s12 = smov 0  }
   0x6 LB: > { %s1003_s13 = sadd.s32 4294967295, %s958_s12   ;;  %s728_s14 = sadd.s32 4294967294, %s958_s12   ;;  %s958_s12 = sphi %s988_s12, %s1455_s12   ;;  %s954_s11 = sphi %s986_s11, %s1454_s11   ;;  %s950_s10 = sphi %s984_s10, %s1453_s10   ;;  %s946_s9 = sphi %s982_s9, %s1452_s9  }
   0x7   : > { %s1007_s15 = sadd.s32 1, %s958_s12   ;;  %s47_s16 = sadd.s32 1, %s954_s11 }
   0x8   : > { %s44_s17 = ssub.s32 %s958_s12, %s1007_s15  ;;  %p54_p0 = scmp.ne.s32.totalorder %s954_s11, %s950_s10 }
   0x9   : > { %p45_p1 = scmp.eq.s32.totalorder %s44_s17, 0  ;;  %p55_p2 = scmp.eq.s32.totalorder %s958_s12, 0 }
   0xa   : > { %p60_p3 = scmp.ne.s32.totalorder %s950_s10, %s946_s9  ;;  %p1439_p4 = scmp.eq.s32.totalorder %s1003_s13, 0 }
   0xb   : > { %s1019_s18 = scalar_select %p45_p1, %s954_s11, %s47_s16  }
   0xc   : > { %p1021_p5 = por %p55_p2, %p54_p0  ;;  %p1027_p6 = por %p1439_p4, %p60_p3 }
   0xd   : > { %p84_p7 = scmp.eq.s32.totalorder %s1003_s13, 3  ;;  %p90_p8 = scmp.eq.s32.totalorder %s728_s14, 3 }
   0xe   : > { %s1442_s20 = scalar_select %p1027_p6, 1, 0 }
   0xf   : > { %p729_p9 = scmp.ge.s32.totalorder %s958_s12, 1  ;;  %p97_p10 = scmp.lt.s32.totalorder %s958_s12, 5 }
  0x10   : > { %p1034_p11 = por %p84_p7, %p54_p0  ;;  %p1038_p12 = por %p90_p8, %p60_p3 }
  0x11   : > { %p1042_p13 = pnand %p729_p9, %p97_p10  ;;  %p768_p2 = scmp.lt.s32.totalorder %s958_s12, 4 }
  0x12   : > { %s1443_s21 = scalar_select %p1034_p11, 1, 0 }
  0x13   : > { %s1444_s22 = scalar_select %p1038_p12, 1, 0 }
  0x14   : > { %p755_p1 = pneg %p1042_p13  ;;  %s119_s24 = sand.u32 1, %s954_s11  }
  0x15   : > { %s745_s25 = sshll.u32 %s958_s12, 12  ;;  %p1055_p0 = pnand %p768_p2, %p1021_p5 }
  0x16   : > { %p756_p6 = pnand %p755_p1, %p1439_p4  ;;  %s732_s27 = sshll.u32 %s119_s24, 8 }
  0x17   : > { %s845_s30 = scalar_lea.hbm %s1435_s0, 16 }
  0x18   : > { %p846_p3 = scmp.ne.s32.totalorder %s1435_s0, %s845_s30  ;;  %p847_p7 = pneg %p756_p6 }
  0x19   : > { %p852_p10 = scmp.lt.u32.totalorder %s845_s30, %s1435_s0 }
  0x1a   : > { %p848_p8 = pnand %p847_p7, %p846_p3 }
  0x1c   : > { %p849_p9 = pneg %p848_p8 }
  0x1e   : > { %p854_p5 = pnand %p852_p10, %p849_p9 }
  0x20   : > { %857 = shalt.err (!%p854_p5)
}
  0x21   : > { %s960_s7 = smov [#allocation2]   ;;  %s1074_s19 = scalar_lea.hbm %s1436_s1, %s745_s25 }
  0x22   : > { %758 = dma.hbm_to_smem (!%p756_p6), %s1435_s0, 16, %s960_s7, [#allocation5]  }
  0x23   : > { %s123_s28 = scalar_lea.vmem [#allocation6], %s732_s27  ;;  %s1078_s30 = scalar_lea.sflag [#allocation3], %s119_s24 }
  0x24   : > { %s130_s29 = sshll.u32 %s123_s28, 4  ;;  %s858_s3 = scalar_lea.hbm %s1074_s19, 4096  ;;  %s1076_s29 = int_to_ptr.vmem [resolvable:$true] %s130_s29 }
  0x25   : > { %p859_p1 = scmp.ne.s32.totalorder %s1074_s19, %s858_s3  ;;  %p860_p2 = pneg %p1055_p0 }
  0x26   : > { %s863_s5 = scalar_lea.hbm %s1436_s1, 16384  ;;  %p864_p7 = scmp.lt.u32.totalorder %s1074_s19, %s1436_s1 }
  0x27   : > { %p861_p6 = pnand %p860_p2, %p859_p1  ;;  %p865_p8 = scmp.lt.u32.totalorder %s863_s5, %s858_s3 }
  0x28   : > { %p867_p10 = scmp.lt.u32.totalorder %s858_s3, %s1074_s19 }
  0x29   : > { %p862_p3 = pneg %p861_p6  ;;  %p866_p9 = por %p865_p8, %p864_p7 }
  0x2b   : > { %p868_p5 = por %p867_p10, %p866_p9 }
  0x2d   : > { %p869_p4 = pnand %p868_p5, %p862_p3 }
  0x2f   : > { %872 = shalt.err (!%p869_p4)
}
  0x30   : > { %s873_s24 = scalar_lea.vmem %s1076_s29, 4096  ;;  %s961_s27 = smov [#allocation6]  }
  0x31   : > { %p874_p1 = scmp.ne.s32.totalorder %s1076_s29, %s873_s24  ;;  %s878_s8 = sshll.u32 %s961_s27, 4  ;;  %s879_s8 = int_to_ptr.vmem [resolvable:$false] %s878_s8 }
  0x32   : > { %s880_s14 = scalar_lea.vmem %s879_s8, 8192  ;;  %p881_p11 = scmp.lt.s32.totalorder %s1076_s29, %s879_s8 }
  0x33   : > { %p876_p6 = pnand %p874_p1, %p860_p2  ;;  %p882_p7 = scmp.lt.s32.totalorder %s880_s14, %s873_s24 }
  0x35   : > { %p877_p12 = pneg %p876_p6  ;;  %p883_p8 = por %p882_p7, %p881_p11 }
  0x37   : > { %p884_p9 = pnand %p883_p8, %p877_p12 }
  0x39   : > { %887 = shalt.err (!%p884_p9)
}
  0x3a   : > { %s962_s16 = smov 128   ;;  %s963_s17 = smov 8  }
  0x3b   : > { %762 = dma.hbm_to_vmem [thread:$0]  (!%p1055_p0), %s1074_s19, 4096, %s1076_s29, %s1078_s30, %s962_s16, %s962_s16, %s963_s17  }
  0x3c   : > { %142 = sbr.rel (%p1042_p13) target bundleno = 482 (0x1e2), region = 28  ;;  %p1447_p4 = scmp.eq.s32.totalorder (!%p1042_p13), %s1003_s13, 0 }
  0x43   : > { %933 = dma.done.wait (%p1447_p4), [#allocation5], 16   ;;  %p1448_p2 = pmov %p1447_p4 }
  0x44   : > { %s1113_s28 = sand.u32 1, %s950_s10   ;;  %p1449_p11 = scmp.ne.s32.totalorder %s1442_s20, 0 }
  0x45   : > { %935 = vsyncadd (%p1448_p2), [#allocation5], 4294967280  ;;  %s737_s3 = sshll.u32 %s1113_s28, 8  ;;  %s149_s25 = scalar_lea.sflag [#allocation3], %s1113_s28 }
  0x46   : > { %s1117_s4 = scalar_lea.vmem [#allocation6], %s737_s3 }
  0x47   : > { %937 = dma.done.wait (%p1449_p11), %s149_s25, 4096  }
  0x48   : > { %939 = vsyncadd (%p1449_p11), %s149_s25, 4294963200 }
  0x49   : > { %157 = sfence }
  0x4a   : > { %v194_v0 = vld [vmem:[%s1117_s4 + $0x80] sm:$0xff]  ;;  %v195_v2 = vld [vmem:[%s1117_s4 + $0x88] sm:$0xff]  ;;  %s1126_s23 = scalar_lea.vmem [#allocation7], %s737_s3  ;;  %v196_v4 = vld [vmem:[%s1117_s4 + $0x90] sm:$0xff]  ;;  %v341_v32 = vlaneseq  ;;  %s176_s20 = sld [smem:[#allocation2]]  ;;  %vm596_vm2 = vcmask 64512  }
  0x4b   : > { %v178_v1 = vld [vmem:[%s1117_s4] sm:$0xff]  ;;  %274 = vxpose.xlu1.b32.start [1/16] (narrow) %v194_v0, 8  ;;  %226 = vst [vmem:[%s1126_s23 + $0x80] sm:$0xff] %v194_v0  ;;  %227 = vst [vmem:[%s1126_s23 + $0x88] sm:$0xff] %v195_v2  ;;  %v179_v3 = vld [vmem:[%s1117_s4 + $0x8] sm:$0xff]  ;;  %s739_s26 = sld [smem:[#allocation2 + $0x1]] }
  0x4c   : > { %242 = vxpose.xlu0.b32.start [1/16] (narrow) %v178_v1, 8  ;;  %210 = vst [vmem:[%s1126_s23] sm:$0xff] %v178_v1  ;;  %v180_v5 = vld [vmem:[%s1117_s4 + $0x10] sm:$0xff]  ;;  %211 = vst [vmem:[%s1126_s23 + $0x8] sm:$0xff] %v179_v3  ;;  %v197_v6 = vld [vmem:[%s1117_s4 + $0x98] sm:$0xff]  ;;  %v1189_v33 = vshrl.u32 %v341_v32, 7  ;;  %s746_s19 = sshll.u32 %s1003_s13, 12 }
  0x4d   : > { %228 = vst [vmem:[%s1126_s23 + $0x90] sm:$0xff] %v196_v4  ;;  %212 = vst [vmem:[%s1126_s23 + $0x10] sm:$0xff] %v180_v5  ;;  %v181_v7 = vld [vmem:[%s1117_s4 + $0x18] sm:$0xff]  ;;  %v198_v8 = vld [vmem:[%s1117_s4 + $0xa0] sm:$0xff]  ;;  %s643_s29 = sshll.u32 %s1126_s23, 4  ;;  %s1388_s6 = scalar_lea.hbm %s1437_s2, %s746_s19  ;;  %s1390_s29 = int_to_ptr.vmem [resolvable:$true] %s643_s29 }
  0x4e   : > { %229 = vst [vmem:[%s1126_s23 + $0x98] sm:$0xff] %v197_v6  ;;  %213 = vst [vmem:[%s1126_s23 + $0x18] sm:$0xff] %v181_v7  ;;  %v182_v9 = vld [vmem:[%s1117_s4 + $0x20] sm:$0xff]  ;;  %v199_v10 = vld [vmem:[%s1117_s4 + $0xa8] sm:$0xff]  ;;  %v343_v36 = vsub.s32 0, %v1189_v33  ;;  %v365_v41 = vsub.s32 1, %v1189_v33 }
  0x4f   : > { %230 = vst [vmem:[%s1126_s23 + $0xa0] sm:$0xff] %v198_v8  ;;  %v183_v11 = vld [vmem:[%s1117_s4 + $0x28] sm:$0xff]  ;;  %214 = vst [vmem:[%s1126_s23 + $0x20] sm:$0xff] %v182_v9  ;;  %v200_v12 = vld [vmem:[%s1117_s4 + $0xb0] sm:$0xff]  ;;  %275 = vxpose.xlu1.b32.cont [2/16] (narrow) %v195_v2, 8  ;;  %v387_v42 = vsub.s32 2, %v1189_v33 }
  0x50   : > { %231 = vst [vmem:[%s1126_s23 + $0xa8] sm:$0xff] %v199_v10  ;;  %215 = vst [vmem:[%s1126_s23 + $0x28] sm:$0xff] %v183_v11  ;;  %v184_v13 = vld [vmem:[%s1117_s4 + $0x30] sm:$0xff]  ;;  %v201_v14 = vld [vmem:[%s1117_s4 + $0xb8] sm:$0xff]  ;;  %243 = vxpose.xlu0.b32.cont [2/16] (narrow) %v179_v3, 8  ;;  %v409_v43 = vsub.s32 3, %v1189_v33 }
  0x51   : > { %232 = vst [vmem:[%s1126_s23 + $0xb0] sm:$0xff] %v200_v12  ;;  %216 = vst [vmem:[%s1126_s23 + $0x30] sm:$0xff] %v184_v13  ;;  %v185_v15 = vld [vmem:[%s1117_s4 + $0x38] sm:$0xff]  ;;  %v202_v16 = vld [vmem:[%s1117_s4 + $0xc0] sm:$0xff]  ;;  %v431_v46 = vsub.s32 4, %v1189_v33  ;;  %v453_v47 = vsub.s32 5, %v1189_v33 }
  0x52   : > { %233 = vst [vmem:[%s1126_s23 + $0xb8] sm:$0xff] %v201_v14  ;;  %v186_v17 = vld [vmem:[%s1117_s4 + $0x40] sm:$0xff]  ;;  %217 = vst [vmem:[%s1126_s23 + $0x38] sm:$0xff] %v185_v15  ;;  %v203_v18 = vld [vmem:[%s1117_s4 + $0xc8] sm:$0xff]  ;;  %v475_v50 = vsub.s32 6, %v1189_v33  ;;  %v497_v55 = vsub.s32 7, %v1189_v33 }
  0x53   : > { %234 = vst [vmem:[%s1126_s23 + $0xc0] sm:$0xff] %v202_v16  ;;  %218 = vst [vmem:[%s1126_s23 + $0x40] sm:$0xff] %v186_v17  ;;  %v187_v19 = vld [vmem:[%s1117_s4 + $0x48] sm:$0xff]  ;;  %v204_v20 = vld [vmem:[%s1117_s4 + $0xd0] sm:$0xff]  ;;  %276 = vxpose.xlu1.b32.cont [3/16] (narrow) %v196_v4, 8  ;;  %s630_s7 = scalar_lea.sflag [#allocation4], %s1113_s28 }
  0x54   : > { %235 = vst [vmem:[%s1126_s23 + $0xc8] sm:$0xff] %v203_v18  ;;  %219 = vst [vmem:[%s1126_s23 + $0x48] sm:$0xff] %v187_v19  ;;  %v188_v21 = vld [vmem:[%s1117_s4 + $0x50] sm:$0xff]  ;;  %v205_v22 = vld [vmem:[%s1117_s4 + $0xd8] sm:$0xff]  ;;  %244 = vxpose.xlu0.b32.cont [3/16] (narrow) %v180_v5, 8  ;;  %s888_s24 = scalar_lea.vmem %s1390_s29, 4096 }
  0x55   : > { %236 = vst [vmem:[%s1126_s23 + $0xd0] sm:$0xff] %v204_v20  ;;  %v189_v23 = vld [vmem:[%s1117_s4 + $0x58] sm:$0xff]  ;;  %220 = vst [vmem:[%s1126_s23 + $0x50] sm:$0xff] %v188_v21  ;;  %v206_v24 = vld [vmem:[%s1117_s4 + $0xe0] sm:$0xff]  ;;  %p889_p12 = scmp.ne.s32.totalorder %s1390_s29, %s888_s24  ;;  %p1450_p13 = scmp.ne.s32.totalorder %s1443_s21, 0 }
  0x56   : > { %237 = vst [vmem:[%s1126_s23 + $0xd8] sm:$0xff] %v205_v22  ;;  %221 = vst [vmem:[%s1126_s23 + $0x58] sm:$0xff] %v189_v23  ;;  %v190_v25 = vld [vmem:[%s1117_s4 + $0x60] sm:$0xff]  ;;  %v207_v26 = vld [vmem:[%s1117_s4 + $0xe8] sm:$0xff]  ;;  %s964_s13 = smov [#allocation7]  }
  0x57   : > { %238 = vst [vmem:[%s1126_s23 + $0xe0] sm:$0xff] %v206_v24  ;;  %222 = vst [vmem:[%s1126_s23 + $0x60] sm:$0xff] %v190_v25  ;;  %v191_v27 = vld [vmem:[%s1117_s4 + $0x68] sm:$0xff]  ;;  %v208_v28 = vld [vmem:[%s1117_s4 + $0xf0] sm:$0xff]  ;;  %277 = vxpose.xlu1.b32.cont [4/16] (narrow) %v197_v6, 8  ;;  %p890_p0 = pnand %p889_p12, %p1450_p13  ;;  %s892_s27 = sshll.u32 %s964_s13, 4  ;;  %s893_s27 = int_to_ptr.vmem [resolvable:$false] %s892_s27 }
  0x58   : > { %239 = vst [vmem:[%s1126_s23 + $0xe8] sm:$0xff] %v207_v26  ;;  %v192_v29 = vld [vmem:[%s1117_s4 + $0x70] sm:$0xff]  ;;  %223 = vst [vmem:[%s1126_s23 + $0x68] sm:$0xff] %v191_v27  ;;  %v209_v30 = vld [vmem:[%s1117_s4 + $0xf8] sm:$0xff]  ;;  %245 = vxpose.xlu0.b32.cont [4/16] (narrow) %v181_v7, 8  ;;  %s894_s8 = scalar_lea.vmem %s893_s27, 8192  ;;  %p895_p10 = scmp.lt.s32.totalorder %s1390_s29, %s893_s27 }
  0x59   : > { %240 = vst [vmem:[%s1126_s23 + $0xf0] sm:$0xff] %v208_v28  ;;  %224 = vst [vmem:[%s1126_s23 + $0x70] sm:$0xff] %v192_v29  ;;  %v193_v31 = vld [vmem:[%s1117_s4 + $0x78] sm:$0xff]  ;;  %v306_v37 = vstv %s176_s20  ;;  %p891_p3 = pneg %p890_p0  ;;  %p896_p5 = scmp.lt.s32.totalorder %s894_s8, %s888_s24 }
  0x5a   : > { %241 = vst [vmem:[%s1126_s23 + $0xf8] sm:$0xff] %v209_v30  ;;  %225 = vst [vmem:[%s1126_s23 + $0x78] sm:$0xff] %v193_v31 }
  0x5b   : > { %278 = vxpose.xlu1.b32.cont [5/16] (narrow) %v198_v8, 8  ;;  %p897_p1 = por %p896_p5, %p895_p10 }
  0x5c   : > { %246 = vxpose.xlu0.b32.cont [5/16] (narrow) %v182_v9, 8 }
  0x5d   : > { %p898_p6 = pnand %p897_p1, %p891_p3 }
  0x5f   : > { %279 = vxpose.xlu1.b32.cont [6/16] (narrow) %v199_v10, 8 }
  0x60   : > { %247 = vxpose.xlu0.b32.cont [6/16] (narrow) %v183_v11, 8 }
  0x63   : > { %280 = vxpose.xlu1.b32.cont [7/16] (narrow) %v200_v12, 8 }
  0x64   : > { %248 = vxpose.xlu0.b32.cont [7/16] (narrow) %v184_v13, 8 }
  0x67   : > { %281 = vxpose.xlu1.b32.cont [8/16] (narrow) %v201_v14, 8 }
  0x68   : > { %249 = vxpose.xlu0.b32.cont [8/16] (narrow) %v185_v15, 8 }
  0x6b   : > { %282 = vxpose.xlu1.b32.cont [9/16] (narrow) %v202_v16, 8 }
  0x6c   : > { %250 = vxpose.xlu0.b32.cont [9/16] (narrow) %v186_v17, 8 }
  0x6f   : > { %283 = vxpose.xlu1.b32.cont [10/16] (narrow) %v203_v18, 8 }
  0x70   : > { %251 = vxpose.xlu0.b32.cont [10/16] (narrow) %v187_v19, 8 }
  0x73   : > { %284 = vxpose.xlu1.b32.cont [11/16] (narrow) %v204_v20, 8 }
  0x74   : > { %252 = vxpose.xlu0.b32.cont [11/16] (narrow) %v188_v21, 8 }
  0x77   : > { %285 = vxpose.xlu1.b32.cont [12/16] (narrow) %v205_v22, 8 }
  0x78   : > { %253 = vxpose.xlu0.b32.cont [12/16] (narrow) %v189_v23, 8 }
  0x7b   : > { %286 = vxpose.xlu1.b32.cont [13/16] (narrow) %v206_v24, 8 }
  0x7c   : > { %254 = vxpose.xlu0.b32.cont [13/16] (narrow) %v190_v25, 8 }
  0x7f   : > { %287 = vxpose.xlu1.b32.cont [14/16] (narrow) %v207_v26, 8 }
  0x80   : > { %255 = vxpose.xlu0.b32.cont [14/16] (narrow) %v191_v27, 8 }
  0x83   : > { %288 = vxpose.xlu1.b32.cont [15/16] (narrow) %v208_v28, 8 }
  0x84   : > { %256 = vxpose.xlu0.b32.cont [15/16] (narrow) %v192_v29, 8 }
  0x87   : > { %289 = vxpose.xlu1.b32.end [16/16] (narrow) %v209_v30, 8 }
  0x88   : > { %257 = vxpose.xlu0.b32.end [16/16] (narrow) %v193_v31, 8 }
  0xcb   : > { %v1191_v34 = vpop.trf.xlu1 }
  0xcc   : > { %v315_v35 = vrot.slane %v1191_v34, 4  ;;  %v1195_v38 = vpop.trf.xlu0  ;;  %v308_v48 = vmul.f32 %v306_v37, %v1191_v34  ;;  %v1206_v49 = vrot.slane %v1191_v34, %v343_v36  ;;  %v1215_v56 = vrot.slane %v1191_v34, %v365_v41 }
  0xcd   : > { %v309_v51 = vrot.slane %v1195_v38, 4  ;;  %v1211_v52 = vmul.f32 %v306_v37, %v1195_v38  ;;  %v1218_v57 = vrot.slane %v1191_v34, %v387_v42  ;;  %v1223_v62 = vrot.slane %v1191_v34, %v409_v43 }
  0xce   : > { %v316_v39 = vmax.f32 %v1191_v34, %v315_v35  ;;  %v328_v40 = vmin.f32 %v1191_v34, %v315_v35  ;;  %v1226_v63 = vrot.slane %v1191_v34, %v431_v46  ;;  %vm334_vm0 = vcmp.ge.f32.partialorder %v308_v48, 0.0 }
  0xcf   : > { %v310_v58 = vmax.f32 %v1195_v38, %v309_v51  ;;  %v322_v59 = vmin.f32 %v1195_v38, %v309_v51  ;;  %v350_v0 = vmul.f32 %v1206_v49, %v308_v48  ;;  %v1232_v5 = vrot.slane %v1191_v34, %v453_v47 }
  0xd0   : > { %v317_v44 = vrot.slane %v316_v39, 2  ;;  %v329_v45 = vrot.slane %v328_v40, 2  ;;  %v1237_v6 = vrot.slane %v1191_v34, %v475_v50  ;;  %v372_v7 = vmul.f32 %v1215_v56, %v308_v48 }
  0xd1   : > { %v311_v1 = vrot.slane %v310_v58, 2  ;;  %v323_v2 = vrot.slane %v322_v59, 2  ;;  %v394_v8 = vmul.f32 %v1218_v57, %v308_v48  ;;  %v416_v13 = vmul.f32 %v1223_v62, %v308_v48 }
  0xd2   : > { %v318_v53 = vmax.f32 %v316_v39, %v317_v44  ;;  %v330_v54 = vmin.f32 %v328_v40, %v329_v45  ;;  %v1245_v14 = vrot.slane %v1191_v34, %v497_v55  ;;  %v438_v15 = vmul.f32 %v1226_v63, %v308_v48 }
  0xd3   : > { %v312_v9 = vmax.f32 %v310_v58, %v311_v1  ;;  %v324_v10 = vmin.f32 %v322_v59, %v323_v2  ;;  %vm333_vm1 = vcmp.ge.f32.partialorder %v1211_v52, 0.0  ;;  %v1250_v17 = vrot.slane %v1195_v38, %v343_v36 }
  0xd4   : > { %v319_v60 = vrot.slane %v318_v53, 1  ;;  %v331_v61 = vrot.slane %v330_v54, 1  ;;  %v460_v19 = vmul.f32 %v1232_v5, %v308_v48  ;;  %v482_v20 = vmul.f32 %v1237_v6, %v308_v48 }
  0xd5   : > { %v313_v16 = vrot.slane %v312_v9, 1  ;;  %v325_v21 = vrot.slane %v324_v10, 1  ;;  %v1256_v25 = vrot.slane %v1195_v38, %v365_v41  ;;  %v504_v27 = vmul.f32 %v1245_v14, %v308_v48 }
  0xd6   : > { %v320_v3 = vmax.f32 %v318_v53, %v319_v60  ;;  %v332_v4 = vmin.f32 %v330_v54, %v331_v61  ;;  %v1260_v28 = vrot.slane %v1195_v38, %v387_v42  ;;  %v1263_v29 = vrot.slane %v1195_v38, %v409_v43 }
  0xd7   : > { %v314_v35 = vmax.f32 %v312_v9, %v313_v16  ;;  %v326_v39 = vmin.f32 %v324_v10, %v325_v21  ;;  %v1266_v40 = vrot.slane %v1195_v38, %v431_v46  ;;  %v349_v42 = vmul.f32 %v1250_v17, %v1211_v52 }
  0xd8   : > { %v336_v11 = vmul.f32 %v320_v3, %v308_v48  ;;  %v338_v12 = vmul.f32 %v332_v4, %v308_v48  ;;  %v371_v43 = vmul.f32 %v1256_v25, %v1211_v52  ;;  %v1277_v48 = vrot.slane %v1195_v38, %v453_v47 }
  0xd9   : > { %v335_v41 = vmul.f32 %v314_v35, %v1211_v52  ;;  %v337_v45 = vmul.f32 %v326_v39, %v1211_v52  ;;  %v393_v53 = vmul.f32 %v1260_v28, %v1211_v52  ;;  %v415_v54 = vmul.f32 %v1263_v29, %v1211_v52 }
  0xda   : > { %v340_v18 = vsel %vm334_vm0, %v336_v11, %v338_v12  ;;  %v437_v60 = vmul.f32 %v1266_v40, %v1211_v52  ;;  %v459_v3 = vmul.f32 %v1277_v48, %v1211_v52  ;;  %v1292_v4 = vrot.slane %v1195_v38, %v475_v50 }
  0xdb   : > { %v352_v22 = vsub.f32 %v350_v0, %v340_v18  ;;  %v374_v23 = vsub.f32 %v372_v7, %v340_v18  ;;  %v396_v24 = vsub.f32 %v394_v8, %v340_v18  ;;  %v418_v26 = vsub.f32 %v416_v13, %v340_v18 }
  0xdc   : > { %v440_v32 = vsub.f32 %v438_v15, %v340_v18  ;;  %v462_v37 = vsub.f32 %v460_v19, %v340_v18  ;;  %v484_v51 = vsub.f32 %v482_v20, %v340_v18  ;;  %v339_v59 = vsel %vm333_vm1, %v335_v41, %v337_v45 }
  0xdd   : > { %v355_v30 = vmul.f32 1.442695, %v352_v22  ;;  %v377_v31 = vmul.f32 1.442695, %v374_v23  ;;  %v399_v36 = vmul.f32 1.442695, %v396_v24  ;;  %v506_v61 = vsub.f32 %v504_v27, %v340_v18 }
  0xde   : > { %v421_v44 = vmul.f32 1.442695, %v418_v26  ;;  %v443_v46 = vmul.f32 1.442695, %v440_v32  ;;  %v465_v58 = vmul.f32 1.442695, %v462_v37  ;;  %v351_v0 = vsub.f32 %v349_v42, %v339_v59 }
  0xdf   : > { %809 = vpow2.f32 %v355_v30  ;;  %v373_v47 = vsub.f32 %v371_v43, %v339_v59  ;;  %v395_v1 = vsub.f32 %v393_v53, %v339_v59  ;;  %v417_v2 = vsub.f32 %v415_v54, %v339_v59 }
  0xe0   : > { %811 = vpow2.f32 %v377_v31  ;;  %v487_v7 = vmul.f32 1.442695, %v484_v51  ;;  %v353_v8 = vmul.f32 1.442695, %v351_v0  ;;  %v439_v11 = vsub.f32 %v437_v60, %v339_v59 }
  0xe1   : > { %813 = vpow2.f32 %v399_v36  ;;  %v375_v9 = vmul.f32 1.442695, %v373_v47  ;;  %v397_v10 = vmul.f32 1.442695, %v395_v1  ;;  %v1297_v12 = vrot.slane %v1195_v38, %v497_v55 }
  0xe2   : > { %815 = vpow2.f32 %v421_v44  ;;  %v509_v13 = vmul.f32 1.442695, %v506_v61  ;;  %v461_v15 = vsub.f32 %v459_v3, %v339_v59  ;;  %v419_v16 = vmul.f32 1.442695, %v417_v2 }
  0xe3   : > { %817 = vpow2.f32 %v443_v46  ;;  %v481_v50 = vmul.f32 %v1292_v4, %v1211_v52  ;;  %v441_v20 = vmul.f32 1.442695, %v439_v11  ;;  %v503_v33 = vmul.f32 %v1297_v12, %v1211_v52 }
  0xe4   : > { %819 = vpow2.f32 %v465_v58  ;;  %v463_v55 = vmul.f32 1.442695, %v461_v15 }
  0xe5   : > { %821 = vpow2.f32 %v353_v8  ;;  %v483_v21 = vsub.f32 %v481_v50, %v339_v59  ;;  %v505_v27 = vsub.f32 %v503_v33, %v339_v59 }
  0xe6   : > { %823 = vpow2.f32 %v375_v9 }
  0xe7   : > { %825 = vpow2.f32 %v487_v7  ;;  %v485_v32 = vmul.f32 1.442695, %v483_v21  ;;  %v507_v52 = vmul.f32 1.442695, %v505_v27 }
  0xe8   : > { %827 = vpow2.f32 %v397_v10 }
  0xe9   : > { %v810_v18 = vpop.eup %809  ;;  %829 = vpow2.f32 %v509_v13 }
  0xea   : > { %v812_v19 = vpop.eup %811  ;;  %v360_v24 = vmul.f32 %v810_v18, %v1206_v49  ;;  %831 = vpow2.f32 %v419_v16 }
  0xeb   : > { %v380_v22 = vadd.f32 %v812_v19, %v810_v18  ;;  %v814_v23 = vpop.eup %813  ;;  %v382_v26 = vmul.f32 %v812_v19, %v1215_v56  ;;  %833 = vpow2.f32 %v441_v20 }
  0xec   : > { %v816_v31 = vpop.eup %815  ;;  %835 = vpow2.f32 %v463_v55  ;;  %v404_v44 = vmul.f32 %v814_v23, %v1218_v57 }
  0xed   : > { %v402_v30 = vadd.f32 %v814_v23, %v380_v22  ;;  %v818_v35 = vpop.eup %817  ;;  %v384_v39 = vadd.f32 %v382_v26, %v360_v24  ;;  %837 = vpow2.f32 %v485_v32  ;;  %v426_v0 = vmul.f32 %v816_v31, %v1223_v62 }
  0xee   : > { %v820_v37 = vpop.eup %819  ;;  %839 = vpow2.f32 %v507_v52  ;;  %v448_v9 = vmul.f32 %v818_v35, %v1226_v63 }
  0xef   : > { %v424_v36 = vadd.f32 %v816_v31, %v402_v30  ;;  %v822_v41 = vpop.eup %821  ;;  %v406_v51 = vadd.f32 %v404_v44, %v384_v39  ;;  %v470_v62 = vmul.f32 %v820_v37, %v1232_v5  ;;  %v527_v30 = vstv %s739_s26 }
  0xf0   : > { %v824_v43 = vpop.eup %823  ;;  %v359_v53 = vmul.f32 %v822_v41, %v1250_v17 }
  0xf1   : > { %v446_v42 = vadd.f32 %v818_v35, %v424_v36  ;;  %v826_v49 = vpop.eup %825  ;;  %v379_v45 = vadd.f32 %v824_v43, %v822_v41  ;;  %v381_v54 = vmul.f32 %v824_v43, %v1256_v25  ;;  %v428_v2 = vadd.f32 %v426_v0, %v406_v51 }
  0xf2   : > { %v828_v46 = vpop.eup %827  ;;  %v492_v21 = vmul.f32 %v826_v49, %v1237_v6 }
  0xf3   : > { %v468_v56 = vadd.f32 %v820_v37, %v446_v42  ;;  %v830_v58 = vpop.eup %829  ;;  %v401_v60 = vadd.f32 %v828_v46, %v379_v45  ;;  %v383_v3 = vadd.f32 %v381_v54, %v359_v53  ;;  %v403_v17 = vmul.f32 %v828_v46, %v1260_v28 }
  0xf4   : > { %v832_v61 = vpop.eup %831  ;;  %v450_v11 = vadd.f32 %v448_v9, %v428_v2  ;;  %v514_v23 = vmul.f32 %v830_v58, %v1245_v14 }
  0xf5   : > { %v490_v59 = vadd.f32 %v826_v49, %v468_v56  ;;  %v423_v1 = vadd.f32 %v832_v61, %v401_v60  ;;  %v834_v57 = vpop.eup %833  ;;  %v405_v13 = vadd.f32 %v403_v17, %v383_v3  ;;  %v425_v50 = vmul.f32 %v832_v61, %v1263_v29 }
  0xf6   : > { %v836_v8 = vpop.eup %835  ;;  %v472_v19 = vadd.f32 %v470_v62, %v450_v11  ;;  %v447_v63 = vmul.f32 %v834_v57, %v1266_v40 }
  0xf7   : > { %v512_v47 = vadd.f32 %v830_v58, %v490_v59  ;;  %v445_v7 = vadd.f32 %v834_v57, %v423_v1  ;;  %v838_v10 = vpop.eup %837  ;;  %v427_v20 = vadd.f32 %v425_v50, %v405_v13  ;;  %v469_v5 = vmul.f32 %v836_v8, %v1277_v48 }
  0xf8   : > { %v840_v16 = vpop.eup %839  ;;  %v494_v33 = vadd.f32 %v492_v21, %v472_v19  ;;  %v491_v32 = vmul.f32 %v838_v10, %v1292_v4 }
  0xf9   : > { %841 = vrcp.f32 %v512_v47  ;;  %v467_v25 = vadd.f32 %v836_v8, %v445_v7  ;;  %v449_v55 = vadd.f32 %v447_v63, %v427_v20  ;;  %v513_v14 = vmul.f32 %v840_v16, %v1297_v12 }
  0xfa   : > { %v516_v26 = vadd.f32 %v514_v23, %v494_v33 }
  0xfb   : > { %v489_v15 = vadd.f32 %v838_v10, %v467_v25  ;;  %v471_v27 = vadd.f32 %v469_v5, %v449_v55 }
  0xfd   : > { %v511_v18 = vadd.f32 %v840_v16, %v489_v15  ;;  %v493_v40 = vadd.f32 %v491_v32, %v471_v27 }
  0xff   : > { %843 = vrcp.f32 %v511_v18  ;;  %v515_v48 = vadd.f32 %v513_v14, %v493_v40 }
 0x103   : > { %v842_v28 = vpop.eup %841 }
 0x104   : > { %v520_v22 = vmul.f32 %v842_v28, %v512_v47 }
 0x106   : > { %v522_v24 = vsub.f32 2.0, %v520_v22 }
 0x108   : > { %v524_v29 = vmul.f32 %v842_v28, %v522_v24 }
 0x109   : > { %v844_v35 = vpop.eup %843 }
 0x10a   : > { %v526_v31 = vmul.f32 %v524_v29, %v516_v26  ;;  %v519_v36 = vmul.f32 %v844_v35, %v511_v18 }
 0x10c   : > { %v529_v6 = vmul.f32 %v527_v30, %v526_v31  ;;  %v521_v39 = vsub.f32 2.0, %v519_v36 }
 0x10e   : > { %v531_v37 = vadd.f32 %v529_v6, %v1191_v34  ;;  %v523_v52 = vmul.f32 %v844_v35, %v521_v39 }
 0x110   : > { %564 = vxpose.xlu1.b32.start.end [1/1] (short) %v531_v37, 128  ;;  %v525_v41 = vmul.f32 %v523_v52, %v515_v48 }
 0x112   : > { %v528_v4 = vmul.f32 %v527_v30, %v525_v41 }
 0x114   : > { %v530_v42 = vadd.f32 %v528_v4, %v1195_v38 }
 0x116   : > { %532 = vxpose.xlu0.b32.start.end [1/1] (short) %v530_v42, 128 }
 0x190   : > { %v580_v43 = vpop.trf.xlu1 }
 0x191   : > { %613 = vst.msk [vmem:[%s1126_s23 + $0x80] sm:$0xff] %vm596_vm2, %v580_v43 }
 0x194   : > { %v581_v34 = vpop.trf.xlu1 }
 0x195   : > { %614 = vst.msk [vmem:[%s1126_s23 + $0x88] sm:$0xff] %vm596_vm2, %v581_v34 }
 0x196   : > { %v548_v12 = vpop.trf.xlu0 }
 0x197   : > { %597 = vst.msk [vmem:[%s1126_s23] sm:$0xff] %vm596_vm2, %v548_v12 }
 0x198   : > { %v582_v44 = vpop.trf.xlu1 }
 0x199   : > { %615 = vst.msk [vmem:[%s1126_s23 + $0x90] sm:$0xff] %vm596_vm2, %v582_v44 }
 0x19a   : > { %v549_v38 = vpop.trf.xlu0 }
 0x19b   : > { %598 = vst.msk [vmem:[%s1126_s23 + $0x8] sm:$0xff] %vm596_vm2, %v549_v38 }
 0x19c   : > { %v583_v49 = vpop.trf.xlu1 }
 0x19d   : > { %616 = vst.msk [vmem:[%s1126_s23 + $0x98] sm:$0xff] %vm596_vm2, %v583_v49 }
 0x19e   : > { %v550_v56 = vpop.trf.xlu0 }
 0x19f   : > { %599 = vst.msk [vmem:[%s1126_s23 + $0x10] sm:$0xff] %vm596_vm2, %v550_v56 }
 0x1a0   : > { %v584_v45 = vpop.trf.xlu1 }
 0x1a1   : > { %617 = vst.msk [vmem:[%s1126_s23 + $0xa0] sm:$0xff] %vm596_vm2, %v584_v45 }
 0x1a2   : > { %v551_v46 = vpop.trf.xlu0 }
 0x1a3   : > { %600 = vst.msk [vmem:[%s1126_s23 + $0x18] sm:$0xff] %vm596_vm2, %v551_v46 }
 0x1a4   : > { %v585_v51 = vpop.trf.xlu1 }
 0x1a5   : > { %618 = vst.msk [vmem:[%s1126_s23 + $0xa8] sm:$0xff] %vm596_vm2, %v585_v51 }
 0x1a6   : > { %v552_v53 = vpop.trf.xlu0 }
 0x1a7   : > { %601 = vst.msk [vmem:[%s1126_s23 + $0x20] sm:$0xff] %vm596_vm2, %v552_v53 }
 0x1a8   : > { %v586_v54 = vpop.trf.xlu1 }
 0x1a9   : > { %619 = vst.msk [vmem:[%s1126_s23 + $0xb0] sm:$0xff] %vm596_vm2, %v586_v54 }
 0x1aa   : > { %v553_v58 = vpop.trf.xlu0 }
 0x1ab   : > { %602 = vst.msk [vmem:[%s1126_s23 + $0x28] sm:$0xff] %vm596_vm2, %v553_v58 }
 0x1ac   : > { %v587_v59 = vpop.trf.xlu1 }
 0x1ad   : > { %620 = vst.msk [vmem:[%s1126_s23 + $0xb8] sm:$0xff] %vm596_vm2, %v587_v59 }
 0x1ae   : > { %v554_v60 = vpop.trf.xlu0 }
 0x1af   : > { %603 = vst.msk [vmem:[%s1126_s23 + $0x30] sm:$0xff] %vm596_vm2, %v554_v60 }
 0x1b0   : > { %v588_v61 = vpop.trf.xlu1 }
 0x1b1   : > { %621 = vst.msk [vmem:[%s1126_s23 + $0xc0] sm:$0xff] %vm596_vm2, %v588_v61 }
 0x1b2   : > { %v555_v0 = vpop.trf.xlu0 }
 0x1b3   : > { %604 = vst.msk [vmem:[%s1126_s23 + $0x38] sm:$0xff] %vm596_vm2, %v555_v0 }
 0x1b4   : > { %v589_v47 = vpop.trf.xlu1 }
 0x1b5   : > { %622 = vst.msk [vmem:[%s1126_s23 + $0xc8] sm:$0xff] %vm596_vm2, %v589_v47 }
 0x1b6   : > { %v556_v1 = vpop.trf.xlu0 }
 0x1b7   : > { %605 = vst.msk [vmem:[%s1126_s23 + $0x40] sm:$0xff] %vm596_vm2, %v556_v1 }
 0x1b8   : > { %v590_v57 = vpop.trf.xlu1 }
 0x1b9   : > { %623 = vst.msk [vmem:[%s1126_s23 + $0xd0] sm:$0xff] %vm596_vm2, %v590_v57 }
 0x1ba   : > { %v557_v2 = vpop.trf.xlu0 }
 0x1bb   : > { %606 = vst.msk [vmem:[%s1126_s23 + $0x48] sm:$0xff] %vm596_vm2, %v557_v2 }
 0x1bc   : > { %v591_v3 = vpop.trf.xlu1 }
 0x1bd   : > { %624 = vst.msk [vmem:[%s1126_s23 + $0xd8] sm:$0xff] %vm596_vm2, %v591_v3 }
 0x1be   : > { %v558_v7 = vpop.trf.xlu0 }
 0x1bf   : > { %607 = vst.msk [vmem:[%s1126_s23 + $0x50] sm:$0xff] %vm596_vm2, %v558_v7 }
 0x1c0   : > { %v592_v8 = vpop.trf.xlu1 }
 0x1c1   : > { %625 = vst.msk [vmem:[%s1126_s23 + $0xe0] sm:$0xff] %vm596_vm2, %v592_v8 }
 0x1c2   : > { %v559_v9 = vpop.trf.xlu0 }
 0x1c3   : > { %608 = vst.msk [vmem:[%s1126_s23 + $0x58] sm:$0xff] %vm596_vm2, %v559_v9 }
 0x1c4   : > { %v593_v17 = vpop.trf.xlu1 }
 0x1c5   : > { %626 = vst.msk [vmem:[%s1126_s23 + $0xe8] sm:$0xff] %vm596_vm2, %v593_v17 }
 0x1c6   : > { %v560_v25 = vpop.trf.xlu0 }
 0x1c7   : > { %609 = vst.msk [vmem:[%s1126_s23 + $0x60] sm:$0xff] %vm596_vm2, %v560_v25 }
 0x1c8   : > { %v594_v10 = vpop.trf.xlu1 }
 0x1c9   : > { %627 = vst.msk [vmem:[%s1126_s23 + $0xf0] sm:$0xff] %vm596_vm2, %v594_v10 }
 0x1ca   : > { %v561_v11 = vpop.trf.xlu0 }
 0x1cb   : > { %610 = vst.msk [vmem:[%s1126_s23 + $0x68] sm:$0xff] %vm596_vm2, %v561_v11 }
 0x1cc   : > { %v595_v13 = vpop.trf.xlu1 }
 0x1cd   : > { %628 = vst.msk [vmem:[%s1126_s23 + $0xf8] sm:$0xff] %vm596_vm2, %v595_v13 }
 0x1ce   : > { %v562_v15 = vpop.trf.xlu0 }
 0x1cf   : > { %611 = vst.msk [vmem:[%s1126_s23 + $0x70] sm:$0xff] %vm596_vm2, %v562_v15 }
 0x1d2   : > { %v563_v16 = vpop.trf.xlu0 }
 0x1d3   : > { %612 = vst.msk [vmem:[%s1126_s23 + $0x78] sm:$0xff] %vm596_vm2, %v563_v16 }
 0x1d4   : > { %901 = shalt.err (!%p898_p6)
}
 0x1d5   : > { %s902_s14 = scalar_lea.hbm %s1388_s6, 4096  ;;  %s906_s3 = scalar_lea.hbm %s1437_s2, 16384 }
 0x1d6   : > { %p903_p7 = scmp.ne.s32.totalorder %s1388_s6, %s902_s14  ;;  %p907_p4 = scmp.lt.u32.totalorder %s1388_s6, %s1437_s2 }
 0x1d7   : > { %p908_p2 = scmp.lt.u32.totalorder %s906_s3, %s902_s14  ;;  %p910_p12 = scmp.lt.u32.totalorder %s902_s14, %s1388_s6 }
 0x1d8   : > { %p904_p8 = pnand %p903_p7, %p1450_p13 }
 0x1d9   : > { %p909_p11 = por %p908_p2, %p907_p4 }
 0x1da   : > { %p905_p9 = pneg %p904_p8 }
 0x1db   : > { %p911_p0 = por %p910_p12, %p909_p11 }
 0x1dd   : > { %p912_p3 = pnand %p911_p0, %p905_p9 }
 0x1df   : > { %915 = shalt.err (!%p912_p3)
}
 0x1e0   : > { %s965_s23 = smov 128   ;;  %s966_s20 = smov 8  }
 0x1e1   : > { %753 = dma.vmem_to_hbm [thread:$0]  (%p1450_p13), %s1390_s29, 4096, %s1388_s6, %s630_s7, %s965_s23, %s965_s23, %s966_s20  }
 0x1e2 PF: > { %p770_p10 = scmp.ge.s32.totalorder %s958_s12, 2  ;;  %s658_s26 = sand.u32 1, %s946_s9  }
 0x1e3   : > { %p1451_p5 = scmp.ne.s32.totalorder %s1444_s22, 0  ;;  %s659_s19 = scalar_lea.sflag [#allocation4], %s658_s26 }
 0x1e5   : > { %p764_p1 = pnand %p770_p10, %p1451_p5 }
 0x1e7   : > { %941 = dma.done.wait (!%p764_p1), %s659_s19, 4096  }
 0x1e8   : > { %943 = vsyncadd (!%p764_p1), %s659_s19, 4294963200  ;;  %p16_p6 = scmp.ge.s32.totalorder %s1007_s15, 6   ;;  %s1452_s9 = smov %s950_s10 }
 0x1e9   : > { %s1453_s10 = smov %s954_s11  ;;  %s1454_s11 = smov %s1019_s18 }
 0x1ea   : > { %s1455_s12 = smov %s1007_s15  ;;  %18 = sbr.rel (!%p16_p6) target bundleno = 6 (0x6), region = 78 }
 0x1f1   :  { %664 = vsyncpa [#allocation3], 1 }
 0x1f2   :  { %666 = vsyncpa [#allocation3 + $0x1], 1 }
 0x1f3   :  { %667 = vsyncpa [#allocation4], 1 }
 0x1f4   :  { %669 = vsyncpa [#allocation4 + $0x1], 1 }
 0x1f5   :  { %670 = vsyncpa [#allocation5], 1 }
 0x1f6   :  { %672 = vsyncpa [#allocation5 + $0x1], 1 }

</bundles_post_ra>
